<compile_context>
chip_gen: v5e
topology: v5e:2x2
jax: 0.10.0
libtpu: 0.0.40
codegen_flags: <defaults>
</compile_context>

<pallas_src>
import functools

import jax
import jax.numpy as jnp
from jax.experimental import pallas as pl
from jax.experimental.pallas import tpu as pltpu


def _vmem_capacity_bytes() -> int:
    """Physical VMEM per TensorCore; falls back to the smallest (v7x, 64 MiB)."""
    try:
        info = pltpu.get_tpu_info()
        cap = getattr(info, "vmem_capacity_bytes", None)
        if cap:
            return int(cap)
    except Exception:
        pass
    return 64 * 1024 * 1024


def _choose_tiles(B: int, N: int):
    """Pick (tile_n, n_tiles, bB): lane tile, #N-tiles, batches per grid step."""
    # Lane tile: 512/256/128 preferred (full 256-wide MXU passes, amortized
    # per-step overhead).  Small N uses the full extent (no pad, masked stores).
    if N >= 512:
        tile_n = 512
    elif N >= 256:
        tile_n = 256
    elif N >= 128:
        tile_n = 128
    else:
        tile_n = N
    n_tiles = pl.cdiv(N, tile_n)

    # Small-N configs: group batches per grid step so each step does enough
    # weight-stationary MXU work to hide the fixed per-step cost.
    bB = 1
    if tile_n < 256:
        bB = min(B, max(1, 256 // max(tile_n, 1)))

    # v7x has 2 TensorCores: keep >= 2 grid steps whenever there is >= 2 steps
    # of independent work available.
    while bB > 1 and pl.cdiv(B, bB) * n_tiles < 2:
        bB = max(1, (bB + 1) // 2)
    if pl.cdiv(B, bB) * n_tiles < 2 and tile_n > 128:
        tile_n = max(128, tile_n // 2)
        n_tiles = pl.cdiv(N, tile_n)
    return tile_n, n_tiles, bB


def _patch_embed_kernel(x_ref, w_ref, b_ref, o_ref):
    # x_ref: (bB, K, tile_n)  transposed patch tile (bf16 or f32)
    # w_ref: (D, K)           projection weight, VMEM-resident across the grid
    # b_ref: (D, 1)           projection bias (f32)
    # o_ref: (bB, D, tile_n)  channel-major output tile
    w = w_ref[...]
    bias = b_ref[...]
    for b in range(x_ref.shape[0]):            # bB is small & static -> unrolled
        acc = jnp.dot(w, x_ref[b], preferred_element_type=jnp.float32)
        o_ref[b] = (acc + bias).astype(o_ref.dtype)


def patch_projection(patches_t, w_mat, bias2d, out_dtype):
    """patches_t: (B, K, N), w_mat: (D, K), bias2d: (D, 1) -> (B, D, N)."""
    B, K, N = patches_t.shape
    D = w_mat.shape[0]

    tile_n, n_tiles, bB = _choose_tiles(B, N)
    b_tiles = pl.cdiv(B, bB)

    in_isz = jnp.dtype(patches_t.dtype).itemsize
    out_isz = jnp.dtype(out_dtype).itemsize

    # VMEM budget from the actual blocks (default double-buffering everywhere),
    # plus headroom, capped well under the physical VMEM (64 MiB per TC on v7x).
    x_blk = bB * K * tile_n * in_isz
    o_blk = bB * D * tile_n * out_isz
    w_bytes = D * K * in_isz
    b_bytes = D * 4
    need = 2 * (x_blk + o_blk) + 2 * (w_bytes + b_bytes)
    vmem_limit = int(min(max(need + (2 << 20), 16 << 20),
                         (_vmem_capacity_bytes() * 55) // 100))

    cost = pl.CostEstimate(
        flops=2 * B * N * K * D,
        transcendentals=0,
        bytes_accessed=B * K * N * in_isz + w_bytes + b_bytes
        + B * D * N * out_isz,
    )

    return pl.pallas_call(
        _patch_embed_kernel,
        out_shape=jax.ShapeDtypeStruct((B, D, N), out_dtype),
        grid_spec=pltpu.PrefetchScalarGridSpec(
            num_scalar_prefetch=0,
            grid=(b_tiles, n_tiles),
            in_specs=[
                pl.BlockSpec((bB, K, tile_n), lambda b, n: (b, 0, n)),
                pl.BlockSpec((D, K), lambda b, n: (0, 0)),   # weight stays resident
                pl.BlockSpec((D, 1), lambda b, n: (0, 0)),   # bias stays resident
            ],
            out_specs=pl.BlockSpec((bB, D, tile_n), lambda b, n: (b, 0, n)),
        ),
        compiler_params=pltpu.CompilerParams(
            dimension_semantics=("parallel", "parallel"),
            vmem_limit_bytes=vmem_limit,
        ),
        cost_estimate=cost,
    )(patches_t, w_mat, bias2d)


def subsample_vit_patch_embeddings(pixel_values, weight, bias, patch_size,
                                   compute_dtype=jnp.bfloat16, out_dtype=None):
    """Forward pass of SubsampleViTPatchEmbeddings.

    pixel_values: (B, C, H, W) float32 (NCHW, like PyTorch)
    weight:       (D, C, P, P) Conv2d weight
    bias:         (D,)         Conv2d bias
    returns:      (B, D * (H//P) * (W//P))  == conv(x).flatten(-3)

    out_dtype defaults to compute_dtype (bf16) to halve output HBM traffic; pass
    compute_dtype=out_dtype=jnp.float32 for exact parity with the f32 Conv2d.
    """
    B, C, H, W = pixel_values.shape
    D = weight.shape[0]
    P = patch_size
    if C != weight.shape[1]:
        raise ValueError(
            "Make sure that the channel dimension of the pixel values match "
            f"with the one set in the configuration. Expected {weight.shape[1]} "
            f"but got {C}.")
    Hp, Wp = H // P, W // P
    N = Hp * Wp
    K = C * P * P
    out_dtype = out_dtype or compute_dtype

    # Transposed im2col: (B, C, H, W) -> (B, K, N), k ordered (c, kh, kw) to
    # match the Conv2d weight layout (D, C, P, P); n ordered (hp, wp).
    # reshape is free; transpose + reshape + cast fuse into ONE XLA copy under
    # jit (single f32 read, single bf16 write).  No padding of N.
    x = pixel_values.reshape(B, C, Hp, P, Wp, P)
    patches_t = jnp.transpose(x, (0, 1, 3, 5, 2, 4)).reshape(B, K, N)
    patches_t = patches_t.astype(compute_dtype)

    w_mat = weight.reshape(D, K).astype(compute_dtype)
    bias2d = bias.reshape(D, 1).astype(jnp.float32)

    # Hot path: (D,K) @ (K,tile_n) GEMM per (batch-tile, N-tile), producing the
    # channel-major (B, D, N) layout directly (no post-kernel transpose/slice).
    out = patch_projection(patches_t, w_mat, bias2d, out_dtype)

    return out.reshape(B, D * N)   # contiguous reshape: free


def _reference(pixel_values, weight, bias, patch_size):
    """Pure-JAX reference using lax conv (mirrors nn.Conv2d, stride=P)."""
    out = jax.lax.conv_general_dilated(
        pixel_values, weight,
        window_strides=(patch_size, patch_size),
        padding="VALID",
        dimension_numbers=("NCHW", "OIHW", "NCHW"),
    ) + bias[None, :, None, None]
    B = out.shape[0]
    return out.reshape(B, -1)


if __name__ == "__main__":
    # SubsampleViTConfig-like small shapes
    batch = 2
    num_channels = 4
    image_size = 16
    patch_size = 4
    hidden_size = 32

    key = jax.random.PRNGKey(0)
    k_x, k_w, k_b = jax.random.split(key, 3)

    pixel_values = jax.random.normal(
        k_x, (batch, num_channels, image_size, image_size), dtype=jnp.float32)
    weight = jax.random.normal(
        k_w, (hidden_size, num_channels, patch_size, patch_size),
        dtype=jnp.float32) * 0.02
    bias = jax.random.normal(k_b, (hidden_size,), dtype=jnp.float32) * 0.02

    fwd_bf16 = jax.jit(functools.partial(
        subsample_vit_patch_embeddings, patch_size=patch_size,
        compute_dtype=jnp.bfloat16))
    fwd_f32 = jax.jit(functools.partial(
        subsample_vit_patch_embeddings, patch_size=patch_size,
        compute_dtype=jnp.float32, out_dtype=jnp.float32))

    out = jax.block_until_ready(fwd_bf16(pixel_values, weight, bias))
    out_f32 = jax.block_until_ready(fwd_f32(pixel_values, weight, bias))
    ref = jax.block_until_ready(_reference(pixel_values, weight, bias, patch_size))

    expected_shape = (batch,
                      hidden_size * (image_size // patch_size) ** 2)
    assert out.shape == expected_shape, out.shape
    assert out_f32.shape == expected_shape, out_f32.shape
    # f32 compute path: tight tolerance against the conv reference (PyTorch parity).
    assert jnp.allclose(out_f32, ref, atol=1e-4, rtol=1e-4)
    # bf16 operands + bf16 output (f32 MXU accumulation): relaxed tolerance.
    assert jnp.allclose(out.astype(jnp.float32), ref, atol=3e-2, rtol=3e-2)

    print("KERNEL_OK")
</pallas_src>

<mosaic_0001>
module attributes {stable_mosaic.version = 11 : i64} {
  func.func @_patch_embed_kernel(%arg0: i32, %arg1: i32, %arg2: memref<1x64x16xbf16, #tpu.memory_space<vmem>>, %arg3: memref<32x64xbf16, #tpu.memory_space<vmem>>, %arg4: memref<32x1xf32, #tpu.memory_space<vmem>>, %arg5: memref<1x32x16xbf16, #tpu.memory_space<vmem>>) attributes {dimension_semantics = [#tpu.dimension_semantics<parallel>, #tpu.dimension_semantics<parallel>], iteration_bounds = array<i64: 2, 1>, scalar_prefetch = 0 : i64, scratch_operands = 0 : i64, tpu.core_type = #tpu.core_type<tc>, window_params = [{transform_indices = @transform_0, window_bounds = array<i64: 1, 64, 16>}, {pipeline_mode = #tpu.pipeline_mode<synchronous>, transform_indices = @transform_1, window_bounds = array<i64: 32, 64>}, {pipeline_mode = #tpu.pipeline_mode<synchronous>, transform_indices = @transform_2, window_bounds = array<i64: 32, 1>}, {transform_indices = @transform_3, window_bounds = array<i64: 1, 32, 16>}]} {
    %c0 = arith.constant 0 : index
    %c0_0 = arith.constant 0 : index
    %0 = vector.load %arg3[%c0, %c0_0] : memref<32x64xbf16, #tpu.memory_space<vmem>>, vector<32x64xbf16>
    %c0_1 = arith.constant 0 : index
    %c0_2 = arith.constant 0 : index
    %1 = vector.load %arg4[%c0_1, %c0_2] : memref<32x1xf32, #tpu.memory_space<vmem>>, vector<32x1xf32>
    %c0_3 = arith.constant 0 : index
    %c0_4 = arith.constant 0 : index
    %c0_5 = arith.constant 0 : index
    %2 = vector.load %arg2[%c0_3, %c0_4, %c0_5] : memref<1x64x16xbf16, #tpu.memory_space<vmem>>, vector<1x64x16xbf16>
    %3 = vector.shape_cast %2 : vector<1x64x16xbf16> to vector<64x16xbf16>
    %cst = arith.constant dense<0.000000e+00> : vector<32x16xf32>
    %4 = tpu.matmul %0, %3, %cst {dimension_numbers = #tpu.dot_dimension_numbers<[1], [0], [0], [1], [0, 0, 1, 1], [], []>} : vector<32x64xbf16>, vector<64x16xbf16>, vector<32x16xf32> -> vector<32x16xf32>
    %5 = vector.broadcast %1 : vector<32x1xf32> to vector<32x16xf32>
    %6 = arith.addf %4, %5 : vector<32x16xf32>
    %7 = arith.truncf %6 : vector<32x16xf32> to vector<32x16xbf16>
    %c0_6 = arith.constant 0 : index
    %c0_7 = arith.constant 0 : index
    %c0_8 = arith.constant 0 : index
    %8 = vector.load %arg5[%c0_6, %c0_7, %c0_8] : memref<1x32x16xbf16, #tpu.memory_space<vmem>>, vector<1x32x16xbf16>
    %9 = vector.shape_cast %8 : vector<1x32x16xbf16> to vector<32x16xbf16>
    %10 = vector.shape_cast %7 : vector<32x16xbf16> to vector<1x32x16xbf16>
    tpu.vector_store %arg5[%c0_6, %c0_7, %c0_8], %10 {strides = array<i32>} : memref<1x32x16xbf16, #tpu.memory_space<vmem>>, vector<1x32x16xbf16>,
    return
  }
  func.func @transform_0(%arg0: i32, %arg1: i32) -> (i32, i32, i32) {
    %c0_i32 = arith.constant 0 : i32
    %c0_i32_0 = arith.constant 0 : i32
    return %arg0, %c0_i32, %arg1 : i32, i32, i32
  }
  func.func @transform_1(%arg0: i32, %arg1: i32) -> (i32, i32) {
    %c0_i32 = arith.constant 0 : i32
    %c0_i32_0 = arith.constant 0 : i32
    %c0_i32_1 = arith.constant 0 : i32
    return %c0_i32, %c0_i32_0 : i32, i32
  }
  func.func @transform_2(%arg0: i32, %arg1: i32) -> (i32, i32) {
    %c0_i32 = arith.constant 0 : i32
    %c0_i32_0 = arith.constant 0 : i32
    %c0_i32_1 = arith.constant 0 : i32
    return %c0_i32, %c0_i32_0 : i32, i32
  }
  func.func @transform_3(%arg0: i32, %arg1: i32) -> (i32, i32, i32) {
    %c0_i32 = arith.constant 0 : i32
    %c0_i32_0 = arith.constant 0 : i32
    return %arg0, %c0_i32, %arg1 : i32, i32, i32
  }
}

</mosaic_0001>

<bundles_post_ra>
// kernel: subsample_vit_patch_embeddings.1
= control target key start
LH: loop header
LB: loop body
LE: loop exit
PB: predicated region body
PF: predicated region fallthrough
CT: control target
= control target key end

     0   :  { %s512_s12 = smov 0   ;;  %s514_s13 = smov 0   ;;  %s567_s0 = inlined_call_operand.vmem [shape: bf16[2,64,16], index: 0, kind: input, shape index: {}]   ;;  %s568_s1 = inlined_call_operand.vmem [shape: bf16[32,64], index: 1, kind: input, shape index: {}]   ;;  %s569_s2 = inlined_call_operand.vmem [shape: f32[32,1], index: 2, kind: input, shape index: {}]   ;;  %s570_s3 = inlined_call_operand.vmem [shape: bf16[2,32,16], index: 3, kind: output, shape index: {}]  }
   0x1   :  { %s516_s14 = smov 0  }
   0x2 LB: > { %s25_s15 = sadd.s32 1, %s485_s13  ;;  %p395_p0 = scmp.ge.s32.totalorder %s489_s14, 1  ;;  %s489_s14 = sphi %s516_s14, %s13_s14   ;;  %s485_s13 = sphi %s514_s13, %s572_s13   ;;  %s481_s12 = sphi %s512_s12, %s571_s12  }
   0x3   : > { %p27_p1 = scmp.ge.s32.totalorder %s25_s15, 2  ;;  %p156_p2 = scmp.lt.s32.totalorder %s489_s14, 3 }
   0x5   : > { %s574_s15 = smov (%p27_p1, %s25_s15), 0  ;;  %p157_p3 = pnand %p395_p0, %p156_p2 }
   0x6   : > { %p186_p4 = scmp.lt.s32.totalorder (!%p157_p3), %s481_s12, 1 }
   0x7   : > { %160 = sbr.rel (%p157_p3) target bundleno = 171 (0xab), region = 32 }
   0xc   : > { %v209_v0 = vld [vmem:[%s569_s2 + $0x10] sm:$0xff]  ;;  %v491_v1 = vmov 0   ;;  %v207_v2 = vld [vmem:[%s569_s2] sm:$0xff]  ;;  %s576_s12 = smov (!%p186_p4, %s481_s12), 1  ;;  %v210_v4 = vld [vmem:[%s569_s2 + $0x18] sm:$0xff]  ;;  %vm273_vm0 = vcmask 523264  }
   0xd   : > { %466 = vset.pattern.permute.xlu1 %v491_v1  ;;  %465 = vset.pattern.permute.xlu0 %v491_v1  ;;  %s428_s20 = sshll.u32 %s576_s12, 5  ;;  %v208_v5 = vld [vmem:[%s569_s2 + $0x8] sm:$0xff]  ;;  %v430_v9 = vld [vmem:[%s568_s1] sm:$0xff]  ;;  %s429_s5 = sshll.u32 %s576_s12, 4  ;;  %vm303_vm1 = vcmask 125952  }
   0xe   : > { %231 = vperm.xlu1 %466, %v209_v0   ;;  %221 = vperm.xlu0 %465, %v207_v2   ;;  %s193_s23 = scalar_lea.vmem %s567_s0, %s428_s20  ;;  %v431_v10 = vld [vmem:[%s568_s1 + $0x8] sm:$0xff]  ;;  %s201_s8 = scalar_lea.vmem %s570_s3, %s429_s5 }
   0xf   : > { %v435_v3 = vld [vmem:[%s193_s23 + $0x18] sm:$0xff]  ;;  %v434_v6 = vld [vmem:[%s193_s23 + $0x10] sm:$0xff]  ;;  %v433_v7 = vld [vmem:[%s193_s23 + $0x8] sm:$0xff] }
  0x10   : > { %284 = vmatpush.bf16.msra.mxu0 %v435_v3  ;;  %436 = vmatpush.bf16.msra.mxu1 %v435_v3  ;;  %v432_v8 = vld [vmem:[%s193_s23] sm:$0xff] }
  0x14   : > { %285 = vmatpush.bf16.msra.mxu0 %v434_v6  ;;  %437 = vmatpush.bf16.msra.mxu1 %v434_v6 }
  0x16   : > { %236 = vperm.xlu1 %466, %v210_v4   ;;  %226 = vperm.xlu0 %465, %v208_v5  }
  0x18   : > { %286 = vmatpush.bf16.msra.mxu0 %v433_v7  ;;  %438 = vmatpush.bf16.msra.mxu1 %v433_v7 }
  0x1c   : > { %287 = vmatpush.bf16.msra.mxu0 %v432_v8  ;;  %439 = vmatpush.bf16.msra.mxu1 %v432_v8 }
  0x1f   : > { %424 = vmatmul.msk.bf16.vlgmr.msra.gmra.mxu0 %vm273_vm0, %v430_v9  ;;  %425 = vmatmul.msk.bf16.vlgmr.msra.gmra.mxu1 %vm273_vm0, %v431_v10 }
  0x80   : > { %v232_v11 = vpop.permute.xlu1 %231  ;;  %v222_v12 = vpop.permute.xlu0 %221 }
  0x88   : > { %v237_v19 = vpop.permute.xlu1 %236  ;;  %v227_v20 = vpop.permute.xlu0 %226 }
  0x9c   : > { %v289_v13 = vpop.f32.mrf.mxu0  ;;  %v294_v14 = vpop.f32.mrf.mxu1 }
  0x9d   : > { %v290_v15 = vadd.f32 %v289_v13, %v222_v12  ;;  %v295_v16 = vadd.f32 %v294_v14, %v232_v11 }
  0x9f   : > { %v299_v17 = vpack.c.bf16 %v290_v15, %v290_v15  ;;  %v301_v18 = vpack.c.bf16 %v295_v16, %v295_v16 }
  0xa1   : > { %304 = vst.msk [vmem:[%s201_s8] sm:$0xf] %vm303_vm1, %v299_v17 }
  0xa2   : > { %306 = vst.msk [vmem:[%s201_s8 + $0x8] sm:$0xf] %vm303_vm1, %v301_v18 }
  0xa4   : > { %v291_v21 = vpop.f32.mrf.mxu0  ;;  %v296_v22 = vpop.f32.mrf.mxu1 }
  0xa5   : > { %v292_v23 = vadd.f32 %v291_v21, %v227_v20  ;;  %v297_v24 = vadd.f32 %v296_v22, %v237_v19 }
  0xa7   : > { %v300_v25 = vpack.c.bf16 %v292_v23, %v292_v23  ;;  %v302_v26 = vpack.c.bf16 %v297_v24, %v297_v24 }
  0xa9   : > { %305 = vst.msk [vmem:[%s201_s8 + $0x4] sm:$0xf] %vm303_vm1, %v300_v25 }
  0xaa   : > { %307 = vst.msk [vmem:[%s201_s8 + $0xc] sm:$0xf] %vm303_vm1, %v302_v26 }
  0xab PF: > { %s13_s14 = sadd.s32 1, %s489_s14   ;;  %s571_s12 = smov %s485_s13 }
  0xac   : > { %p10_p5 = scmp.ge.s32.totalorder %s13_s14, 4   ;;  %s572_s13 = smov %s574_s15 }
  0xae   :  { %12 = sbr.rel (!%p10_p5) target bundleno = 2 (0x2), region = 62 }

</bundles_post_ra>
